<compile_context>
chip_gen: v7x
topology: tpu7x:2x2x1
jax: 0.10.0
libtpu: 0.0.40
codegen_flags: <defaults>
</compile_context>

<pallas_src>
import functools

import jax
import jax.numpy as jnp
from jax.experimental import pallas as pl
from jax.experimental.pallas import tpu as pltpu


OUT_DIM = 49          # nn.Linear(num_latents, 49)
OUT_DIM_PAD = 128     # feature axis padded to a full lane width
NEG_SLOPE = 0.01      # PyTorch F.leaky_relu default


def _round_up(x, m):
    return ((x + m - 1) // m) * m


def _latents_to_decoder_kernel(x_ref, w_ref, b_ref, o_ref):
    # x_ref: [TM, L] (stream dtype), w_ref: [L, 128] f32, b_ref: [1, 128] f32,
    # o_ref: [TM, 128] (out dtype).
    # Cheap in-VMEM upcast (keeps the HBM stream narrow if x is bf16), f32
    # accumulation on the MXU, f32 epilogue, cast only at the store.
    x = x_ref[...].astype(jnp.float32)
    z = jnp.dot(x, w_ref[...], preferred_element_type=jnp.float32)
    z = z + b_ref[...]                              # broadcast [1, 128] over rows
    o_ref[...] = jnp.where(z > 0, z, NEG_SLOPE * z).astype(o_ref.dtype)


def latents_to_decoder_padded(x, w_pad, b_pad, *, tile_m=2048,
                              single_block_max=512, out_dtype=None):
    """leaky_relu(x @ W.T + b), 128-lane padded output (no post-kernel copies).

    x:     [B, L]  f32 or bf16 (streamed as-is; bf16 halves HBM traffic)
    w_pad: [L, 128] f32, columns >= 49 zero
    b_pad: [1, 128] f32, columns >= 49 zero

    Returns [B, 128] in `out_dtype` (default x.dtype).  Columns >= 49 are
    exactly zero (leaky_relu(0) == 0), so the caller may slice [:, :49] only
    at the very end of the network -- or feed the padded slab straight into a
    fused consumer.
    """
    B, L = x.shape
    n_pad = w_pad.shape[1]
    out_dtype = x.dtype if out_dtype is None else out_dtype

    if B <= single_block_max:
        # Tiny-batch path: no grid, no pipeline -- whole arrays as VMEM blocks.
        return pl.pallas_call(
            _latents_to_decoder_kernel,
            out_shape=jax.ShapeDtypeStruct((B, n_pad), out_dtype),
            in_specs=[
                pl.BlockSpec(memory_space=pltpu.MemorySpace.VMEM),
                pl.BlockSpec(memory_space=pltpu.MemorySpace.VMEM),
                pl.BlockSpec(memory_space=pltpu.MemorySpace.VMEM),
            ],
            out_specs=pl.BlockSpec(memory_space=pltpu.MemorySpace.VMEM),
        )(x, w_pad, b_pad)

    # Batch-streaming path: tile the batch axis, weight/bias grid-resident.
    # Guarantee >= 2 grid tiles so v7x can shard steps across its two
    # TensorCores; keep tile_m a multiple of 8 (sublane alignment).  Ragged
    # last tiles are handled by Pallas boundary masking -- no jnp.pad, no
    # out[:B] slice.
    tm = max(8, min(tile_m, _round_up(pl.cdiv(B, 2), 8)))
    num_tiles = pl.cdiv(B, tm)
    return pl.pallas_call(
        _latents_to_decoder_kernel,
        out_shape=jax.ShapeDtypeStruct((B, n_pad), out_dtype),
        grid_spec=pltpu.PrefetchScalarGridSpec(
            num_scalar_prefetch=0,
            grid=(num_tiles,),
            in_specs=[
                pl.BlockSpec((tm, L), lambda i: (i, 0)),
                pl.BlockSpec((L, n_pad), lambda i: (0, 0)),
                pl.BlockSpec((1, n_pad), lambda i: (0, 0)),
            ],
            out_specs=pl.BlockSpec((tm, n_pad), lambda i: (i, 0)),
        ),
        compiler_params=pltpu.CompilerParams(
            dimension_semantics=("parallel",),
        ),
    )(x, w_pad, b_pad)


def latents_to_decoder(x, w_pad, b_pad, **kwargs):
    """Exact PyTorch module semantics: returns [B, 49].

    Note: the [:, :49] slice is a separate XLA copy kernel; when this layer
    feeds another one, prefer `latents_to_decoder_padded` and slice only at
    the network output (or fuse the consumer into the kernel).
    """
    return latents_to_decoder_padded(x, w_pad, b_pad, **kwargs)[:, :OUT_DIM]


def init_params(key, num_latents, out_dim=OUT_DIM, out_dim_pad=OUT_DIM_PAD):
    """nn.Linear-style init (uniform +/- 1/sqrt(fan_in)), lane-padded to 128."""
    kw, kb = jax.random.split(key)
    bound = 1.0 / jnp.sqrt(jnp.float32(num_latents))
    # PyTorch weight is [out_dim, num_latents]; kernel consumes it transposed.
    w_t = jax.random.uniform(kw, (num_latents, out_dim), jnp.float32, -bound, bound)
    b = jax.random.uniform(kb, (1, out_dim), jnp.float32, -bound, bound)
    w_pad = jnp.zeros((num_latents, out_dim_pad), jnp.float32).at[:, :out_dim].set(w_t)
    b_pad = jnp.zeros((1, out_dim_pad), jnp.float32).at[:, :out_dim].set(b)
    return w_t, b, w_pad, b_pad


def _reference(x, w_t, b):
    z = x @ w_t + b
    return jnp.where(z > 0, z, NEG_SLOPE * z)


if __name__ == "__main__":
    key = jax.random.PRNGKey(0)
    k_p, k1, k2, k3, k4 = jax.random.split(key, 5)

    num_latents = 32
    w_t, b, w_pad, b_pad = init_params(k_p, num_latents)

    # --- tiny batch: single-block (no-grid) path, exact PyTorch semantics ----
    x = jax.random.normal(k1, (8, num_latents), jnp.float32)
    y = jax.block_until_ready(jax.jit(latents_to_decoder)(x, w_pad, b_pad))
    assert y.shape == (8, OUT_DIM)
    assert jnp.allclose(y, _reference(x, w_t, b), atol=1e-5, rtol=1e-5)

    # --- medium batch: gridded "parallel" path, f32 streaming, padded out ----
    fwd_pad = jax.jit(functools.partial(
        latents_to_decoder_padded, tile_m=512, single_block_max=256))
    x2 = jax.random.normal(k2, (1024, num_latents), jnp.float32)
    y2 = jax.block_until_ready(fwd_pad(x2, w_pad, b_pad))
    assert y2.shape == (1024, OUT_DIM_PAD)
    assert bool(jnp.all(y2[:, OUT_DIM:] == 0))      # padded lanes exactly zero
    assert jnp.allclose(y2[:, :OUT_DIM], _reference(x2, w_t, b),
                        atol=1e-5, rtol=1e-5)

    # --- ragged batch: last grid tile is partial (masked boundary writes) ----
    fwd_ragged = jax.jit(functools.partial(
        latents_to_decoder_padded, tile_m=256, single_block_max=64))
    x3 = jax.random.normal(k3, (1000, num_latents), jnp.float32)
    y3 = jax.block_until_ready(fwd_ragged(x3, w_pad, b_pad))
    assert y3.shape == (1000, OUT_DIM_PAD)
    assert jnp.allclose(y3[:, :OUT_DIM], _reference(x3, w_t, b),
                        atol=1e-5, rtol=1e-5)

    # --- bf16 streaming: halves HBM read+write; f32 accumulate + epilogue ----
    x4 = jax.random.normal(k4, (1024, num_latents), jnp.float32).astype(jnp.bfloat16)
    y4 = jax.block_until_ready(fwd_pad(x4, w_pad, b_pad))
    assert y4.shape == (1024, OUT_DIM_PAD) and y4.dtype == jnp.bfloat16
    y4_ref = _reference(x4.astype(jnp.float32), w_t, b)
    assert jnp.allclose(y4[:, :OUT_DIM].astype(jnp.float32), y4_ref,
                        atol=2e-2, rtol=2e-2)

    print("KERNEL_OK")
</pallas_src>

<mosaic_0001>
module attributes {stable_mosaic.version = 11 : i64} {
  func.func @_latents_to_decoder_kernel(%arg0: memref<8x32xf32, #tpu.memory_space<vmem>>, %arg1: memref<32x128xf32, #tpu.memory_space<vmem>>, %arg2: memref<1x128xf32, #tpu.memory_space<vmem>>, %arg3: memref<8x128xf32, #tpu.memory_space<vmem>>) attributes {dimension_semantics = [], scalar_prefetch = 0 : i64, scratch_operands = 0 : i64, tpu.core_type = #tpu.core_type<tc>} {
    %c0 = arith.constant 0 : index
    %c0_0 = arith.constant 0 : index
    %0 = vector.load %arg0[%c0, %c0_0] : memref<8x32xf32, #tpu.memory_space<vmem>>, vector<8x32xf32>
    %c0_1 = arith.constant 0 : index
    %c0_2 = arith.constant 0 : index
    %1 = vector.load %arg1[%c0_1, %c0_2] : memref<32x128xf32, #tpu.memory_space<vmem>>, vector<32x128xf32>
    %cst = arith.constant dense<0.000000e+00> : vector<8x128xf32>
    %2 = tpu.matmul %0, %1, %cst {dimension_numbers = #tpu.dot_dimension_numbers<[1], [0], [0], [1], [0, 0, 1, 1], [], []>} : vector<8x32xf32>, vector<32x128xf32>, vector<8x128xf32> -> vector<8x128xf32>
    %c0_3 = arith.constant 0 : index
    %c0_4 = arith.constant 0 : index
    %3 = vector.load %arg2[%c0_3, %c0_4] : memref<1x128xf32, #tpu.memory_space<vmem>>, vector<1x128xf32>
    %4 = vector.broadcast %3 : vector<1x128xf32> to vector<8x128xf32>
    %5 = arith.addf %2, %4 : vector<8x128xf32>
    %cst_5 = arith.constant 0.000000e+00 : f32
    %6 = vector.broadcast %cst_5 : f32 to vector<8x128xf32>
    %7 = arith.cmpf ogt, %5, %6 : vector<8x128xf32>
    %cst_6 = arith.constant 0.00999999977 : f32
    %8 = vector.broadcast %cst_6 : f32 to vector<8x128xf32>
    %9 = arith.mulf %8, %5 : vector<8x128xf32>
    %10 = arith.select %7, %5, %9 : vector<8x128xi1>, vector<8x128xf32>
    %c0_7 = arith.constant 0 : index
    %c0_8 = arith.constant 0 : index
    %11 = vector.load %arg3[%c0_7, %c0_8] : memref<8x128xf32, #tpu.memory_space<vmem>>, vector<8x128xf32>
    tpu.vector_store %arg3[%c0_7, %c0_8], %10 {strides = array<i32>} : memref<8x128xf32, #tpu.memory_space<vmem>>, vector<8x128xf32>,
    return
  }
}

</mosaic_0001>

<bundles_post_ra>
// kernel: latents_to_decoder.1
= control target key start
LH: loop header
LB: loop body
LE: loop exit
PB: predicated region body
PF: predicated region fallthrough
CT: control target
= control target key end

     0   :  { %8 = vsyncpa [#allocation3], 0  ;;  %s325_s0 = inlined_call_operand.hbm [shape: f32[8,32], index: 0, kind: input, shape index: {}]   ;;  %s326_s1 = inlined_call_operand.hbm [shape: f32[32,128], index: 1, kind: input, shape index: {}]   ;;  %s327_s2 = inlined_call_operand.vmem [shape: f32[1,128], index: 2, kind: input, shape index: {}]   ;;  %s328_s3 = inlined_call_operand.hbm [shape: f32[8,128], index: 3, kind: output, shape index: {}]  }
   0x1   :  { %9 = vsyncpa [#allocation6], 0 }
   0x2   :  { %10 = vsyncpa [#allocation4], 0  ;;  %s251_s12 = smov [#allocation2]   ;;  %s252_s14 = smov [#allocation5]  }
   0x3   :  { %s17_s13 = sshll.u32 %s251_s12, 4  ;;  %s26_s15 = sshll.u32 %s252_s14, 4  ;;  %s18_s13 = int_to_ptr.vmem [resolvable:$true] %s17_s13  ;;  %s279_s15 = int_to_ptr.vmem [resolvable:$true] %s26_s15 }
   0x4   :  { %s179_s18 = scalar_lea.hbm %s325_s0, 128 }
   0x5   :  { %p180_p0 = scmp.ne.s32.totalorder %s325_s0, %s179_s18  ;;  %p183_p1 = scmp.lt.u32.totalorder %s179_s18, %s325_s0 }
   0x7   :  { %p185_p2 = pnand %p183_p1, %p180_p0 }
   0x9   :  { %188 = shalt.err (!%p185_p2)
}
   0xa   :  { %s189_s23 = scalar_lea.vmem %s18_s13, 128  ;;  %p194_p4 = scmp.lt.s32.totalorder %s18_s13, %s18_s13 }
   0xb   :  { %p190_p3 = scmp.ne.s32.totalorder %s18_s13, %s189_s23  ;;  %p195_p5 = scmp.lt.s32.totalorder %s189_s23, %s189_s23 }
   0xd   :  { %p196_p6 = por %p195_p5, %p194_p4 }
   0xf   :  { %p197_p7 = pnand %p196_p6, %p190_p3 }
  0x11   :  { %200 = shalt.err (!%p197_p7)
}
  0x12   :  { %20 = dma.hbm_to_vmem [thread:$0]  %s325_s0, 128, %s18_s13, [#allocation3]  }
  0x13   :  { %s201_s28 = scalar_lea.hbm %s326_s1, 512 }
  0x14   :  { %p202_p8 = scmp.ne.s32.totalorder %s326_s1, %s201_s28  ;;  %p205_p9 = scmp.lt.u32.totalorder %s201_s28, %s326_s1 }
  0x16   :  { %p207_p10 = pnand %p205_p9, %p202_p8 }
  0x18   :  { %210 = shalt.err (!%p207_p10)
}
  0x19   :  { %s211_s6 = scalar_lea.vmem %s279_s15, 512  ;;  %p216_p12 = scmp.lt.s32.totalorder %s279_s15, %s279_s15 }
  0x1a   :  { %p212_p11 = scmp.ne.s32.totalorder %s279_s15, %s211_s6  ;;  %p217_p13 = scmp.lt.s32.totalorder %s211_s6, %s211_s6 }
  0x1c   :  { %p218_p0 = por %p217_p13, %p216_p12 }
  0x1e   :  { %p219_p1 = pnand %p218_p0, %p212_p11 }
  0x20   :  { %222 = shalt.err (!%p219_p1)
}
  0x21   :  { %s253_s0 = smov 128   ;;  %s254_s7 = smov 8  }
  0x22   :  { %32 = dma.hbm_to_vmem [thread:$0]  %s326_s1, 512, %s279_s15, [#allocation6], %s253_s0, %s253_s0, %s254_s7  }
  0x23   :  { %245 = dma.done.wait [#allocation3], 128  }
  0x24   :  { %246 = vsyncadd [#allocation3], 4294967168 }
  0x25   :  { %247 = dma.done.wait [#allocation6], 512  }
  0x26   :  { %248 = vsyncadd [#allocation6], 4294966784  ;;  %v255_v0 = vmov 0.0|0.0   ;;  %vm256_vm0 = vmmov 0   ;;  %v257_v1 = vmov 0.0   ;;  %v42_v2 = vld [vmem:[#allocation5] sm:$0xff] }
  0x27   :  { %165 = vmatprep.subr.bf16.mxu0 %v255_v0  ;;  %162 = vmatprep.mubr.msk.f32.mxu0 %vm256_vm0, %v257_v1  ;;  %v43_v3 = vld [vmem:[#allocation5 + $0x8] sm:$0xff]  ;;  %v44_v4 = vld [vmem:[#allocation5 + $0x10] sm:$0xff]  ;;  %v45_v6 = vld [vmem:[#allocation5 + $0x18] sm:$0xff]  ;;  %vm53_vm1 = vcmask 261120   ;;  %s258_s11 = smov [#allocation7]  }
  0x28   :  { %v166_v5 = vpack.c.bf16 %v43_v3, %v42_v2  ;;  %v169_v7 = vpack.c.bf16 %v45_v6, %v44_v4  ;;  %v41_v8 = vld [vmem:[#allocation2] sm:$0xff]  ;;  %s137_s12 = sshll.u32 %s258_s11, 4  ;;  %s138_s12 = int_to_ptr.vmem [resolvable:$true] %s137_s12 }
  0x29   :  { %v147_v9 = vld [vmem:[%s327_s2] ss:$0 sm:$0xff]  ;;  %s223_s13 = scalar_lea.vmem %s138_s12, 128  ;;  %p228_p3 = scmp.lt.s32.totalorder %s138_s12, %s138_s12 }
  0x2a   :  { %167 = vmatpush3.bf16.msra.mxu0 %v166_v5  ;;  %p224_p2 = scmp.ne.s32.totalorder %s138_s12, %s223_s13  ;;  %p229_p4 = scmp.lt.s32.totalorder %s223_s13, %s223_s13 }
  0x2b   :  { %168 = vmatprep.subr.bf16.mxu0 %v255_v0 }
  0x2c   :  { %p230_p5 = por %p229_p4, %p228_p3 }
  0x2e   :  { %170 = vmatpush3.bf16.msra.mxu0 %v169_v7  ;;  %p231_p6 = pnand %p230_p5, %p224_p2 }
  0x31   :  { %163 = vmatmul.mubr.msk.f32.vlgmr.msra.gmra.mrb[0].mxu0 %vm53_vm1, %v41_v8 }
 0x104   :  { %v123_v10 = vpop.f32.mrb[0].mxu0 }
 0x105   :  { %v124_v11 = vadd.f32 %v147_v9, %v123_v10  ;;  %v164_v12 = vpop.f32.mrb[1].mxu0 }
 0x107   :  { %v128_v13 = vmul.f32 0.01, %v124_v11  ;;  %vm127_vm2 = vcmp.gt.f32.partialorder %v124_v11, 0.0 }
 0x109   :  { %v129_v14 = vsel %vm127_vm2, %v124_v11, %v128_v13 }
 0x10a   :  { %130 = vst [vmem:[#allocation7] sm:$0xff] %v129_v14 }
 0x10b   :  { %234 = shalt.err (!%p231_p6)
}
 0x10c   :  { %s235_s2 = scalar_lea.hbm %s328_s3, 128 }
 0x10d   :  { %p236_p7 = scmp.ne.s32.totalorder %s328_s3, %s235_s2  ;;  %p239_p8 = scmp.lt.u32.totalorder %s235_s2, %s328_s3 }
 0x10f   :  { %p241_p9 = pnand %p239_p8, %p236_p7 }
 0x111   :  { %244 = shalt.err (!%p241_p9)
}
 0x112   :  { %140 = dma.vmem_to_hbm [thread:$0]  %s138_s12, 128, %s328_s3, [#allocation4]  }
 0x113   :  { %249 = dma.done.wait [#allocation4], 128  }
 0x114   :  { %250 = vsyncadd [#allocation4], 4294967168 }
 0x115   :  { %144 = vsyncpa [#allocation3], 1 }
 0x116   :  { %145 = vsyncpa [#allocation6], 1 }
 0x117   :  { %146 = vsyncpa [#allocation4], 1 }

</bundles_post_ra>
